<compile_context>
chip_gen: v7x
topology: tpu7x:2x2x1
jax: 0.10.0
libtpu: 0.0.40
codegen_flags: <defaults>
</compile_context>

<pallas_src>
import functools

import jax
import jax.numpy as jnp
import numpy as np
from jax.experimental import pallas as pl
from jax.experimental.pallas import tpu as pltpu


# ---------------------------------------------------------------------------
# Import-time capability detection (done once, not per call).
# ---------------------------------------------------------------------------
_WEIGHT_PIPELINE = pl.Buffered(1) if hasattr(pl, "Buffered") else None

try:  # physical VMEM of the local chip generation (v5e/v6e: 128 MiB, v7x: 64 MiB)
    _VMEM_CAPACITY = int(pltpu.get_tpu_info().vmem_capacity_bytes)
except Exception:  # conservative default if the query is unavailable
    _VMEM_CAPACITY = 64 * 1024 * 1024


def _layer_norm(x, w, b, eps=1e-5):
    mu = jnp.mean(x, axis=-1, keepdims=True)
    var = jnp.mean((x - mu) ** 2, axis=-1, keepdims=True)
    return (x - mu) * jax.lax.rsqrt(var + eps) * w + b


def block_kernel(x_ref, ln1w_ref, ln1b_ref, qkvw_ref, qkvb_ref,
                 projw_ref, projb_ref, ln2w_ref, ln2b_ref,
                 fc1w_ref, fc1b_ref, fc2w_ref, fc2b_ref,
                 out_ref, y_scr, *, heads):
    x = x_ref[...].astype(jnp.float32)                     # (N, C) f32
    N, C = x.shape
    hd = C // heads

    # ---- Attention branch: y = proj(softmax(q k^T) v); scale pre-folded into Q ----
    xn = _layer_norm(x, ln1w_ref[...], ln1b_ref[...])
    qkv = jnp.dot(xn.astype(jnp.bfloat16), qkvw_ref[...],
                  preferred_element_type=jnp.float32) + qkvb_ref[...]   # (N, 3C) f32

    # Per-head attention on static lane slices of `qkv` (no (heads,N,hd) stack /
    # re-layout). Head outputs are stored to y_scr in lane-dense groups so the
    # vector stores are >=128 lanes wide whenever possible.
    group = 1
    while group < heads and group * hd < 128 and heads % (group * 2) == 0:
        group *= 2

    for g0 in range(0, heads, group):
        ctx_parts = []
        for h in range(g0, g0 + group):
            q_h = qkv[:, 0 * C + h * hd:0 * C + (h + 1) * hd].astype(jnp.bfloat16)
            k_h = qkv[:, 1 * C + h * hd:1 * C + (h + 1) * hd].astype(jnp.bfloat16)
            v_h = qkv[:, 2 * C + h * hd:2 * C + (h + 1) * hd].astype(jnp.bfloat16)

            s = jax.lax.dot_general(q_h, k_h, (((1,), (1,)), ((), ())),
                                    preferred_element_type=jnp.float32)  # (N, N) f32
            s = s - jnp.max(s, axis=-1, keepdims=True)
            p = jnp.exp(s)
            p = p * pl.reciprocal(jnp.sum(p, axis=-1, keepdims=True), approx=True)
            ctx = jnp.dot(p.astype(jnp.bfloat16), v_h,
                          preferred_element_type=jnp.float32)            # (N, hd) f32
            ctx_parts.append(ctx.astype(jnp.bfloat16))
        blk = ctx_parts[0] if group == 1 else jnp.concatenate(ctx_parts, axis=-1)
        y_scr[:, g0 * hd:(g0 + group) * hd] = blk

    y = jnp.dot(y_scr[...], projw_ref[...],
                preferred_element_type=jnp.float32) + projb_ref[...]
    x1 = x + y                                             # residual 1 (f32)

    # ---- MLP branch: x1 + fc2(gelu(fc1(norm2(x1)))) ----
    x1n = _layer_norm(x1, ln2w_ref[...], ln2b_ref[...])
    h1 = jnp.dot(x1n.astype(jnp.bfloat16), fc1w_ref[...],
                 preferred_element_type=jnp.float32) + fc1b_ref[...]
    # tanh-GELU: transcendental goes to the EUP slot; ~3e-3 max abs deviation
    # from nn.GELU()'s exact erf, inside the bf16-matmul tolerance.
    h1 = jax.nn.gelu(h1, approximate=True)
    h2 = jnp.dot(h1.astype(jnp.bfloat16), fc2w_ref[...],
                 preferred_element_type=jnp.float32) + fc2b_ref[...]

    out_ref[...] = (x1 + h2).astype(out_ref.dtype)         # residual 2


def pack_block_weights(params, heads):
    """Host-side weight plumbing (call ONCE, reuse the result): transpose Linear
    weights to (in, out), fold the attention scale into the Q projection, keep
    matmul weights bf16 and LayerNorm params / biases f32."""
    C = params["ln1_w"].shape[-1]
    assert C % heads == 0, "dim must be divisible by heads"
    hd = C // heads
    scale = hd ** (-0.5)

    qkv_w = params["qkv_w"].T.astype(jnp.float32)          # (C, 3C)
    qkv_b = params["qkv_b"].reshape(1, -1).astype(jnp.float32)
    col_scale = jnp.concatenate(
        [jnp.full((C,), scale, jnp.float32), jnp.ones((2 * C,), jnp.float32)])
    qkv_w = qkv_w * col_scale[None, :]                     # scale Q columns only
    qkv_b = qkv_b * col_scale[None, :]

    return [
        params["ln1_w"].reshape(1, C).astype(jnp.float32),
        params["ln1_b"].reshape(1, C).astype(jnp.float32),
        qkv_w.astype(jnp.bfloat16),
        qkv_b,
        params["proj_w"].T.astype(jnp.bfloat16),           # (C, C)
        params["proj_b"].reshape(1, C).astype(jnp.float32),
        params["ln2_w"].reshape(1, C).astype(jnp.float32),
        params["ln2_b"].reshape(1, C).astype(jnp.float32),
        params["fc1_w"].T.astype(jnp.bfloat16),            # (C, mlp_dim)
        params["fc1_b"].reshape(1, -1).astype(jnp.float32),
        params["fc2_w"].T.astype(jnp.bfloat16),            # (mlp_dim, C)
        params["fc2_b"].reshape(1, C).astype(jnp.float32),
    ]


def _vmem_limit_bytes(N, C, mlp_dim, heads):
    """Actual footprint + headroom, clamped to ~85% of physical VMEM (never
    100% of the chip like the old hardcoded 64 MiB, which equals all of v7x)."""
    wbytes = 2 * (3 * C * C + C * C + 2 * C * mlp_dim) + 4 * (8 * C + 3 * C + mlp_dim)
    act = 4 * N * (3 * C + 4 * C + mlp_dim) + 4 * N * N   # f32 activations + per-head scores
    io = 2 * (2 * N * C * 4)                              # double-buffered x / out blocks
    scr = N * C * 2                                       # y_scr (bf16)
    need = int((wbytes + act + io + scr) * 1.5) + (16 << 20)  # compiler scratch headroom
    cap = int(_VMEM_CAPACITY * 0.85)
    return max(32 << 20, min(need, cap))


def _weight_spec(shape):
    # All packed weights are 2-D with a constant block index (fetched once);
    # single-buffer them when this JAX supports pipeline_mode (detected at import).
    if _WEIGHT_PIPELINE is None:
        return pl.BlockSpec(shape, lambda b: (0, 0))
    return pl.BlockSpec(shape, lambda b: (0, 0), pipeline_mode=_WEIGHT_PIPELINE)


# TODO(synk): for long sequences / ViT-L scale, add (a) a KV-tile grid axis with
# flash-style online softmax so the per-head (N,N) scores and (N,3C)/(N,mlp)
# activations need not be VMEM-resident at once, and (b) a token-tile parallel
# axis so both v7x TensorCores stay busy at B=1. Unnecessary at these sizes.
@functools.lru_cache(maxsize=None)
def _build_call(B, N, C, mlp_dim, heads, out_dtype_name):
    weight_shapes = [
        (1, C), (1, C),                 # ln1 w/b
        (C, 3 * C), (1, 3 * C),         # qkv w/b
        (C, C), (1, C),                 # proj w/b
        (1, C), (1, C),                 # ln2 w/b
        (C, mlp_dim), (1, mlp_dim),     # fc1 w/b
        (mlp_dim, C), (1, C),           # fc2 w/b
    ]
    in_specs = [pl.BlockSpec((None, N, C), lambda b: (b, 0, 0))]
    in_specs += [_weight_spec(s) for s in weight_shapes]

    # Advisory cost hints for XLA's scheduler around the custom call.
    flops = 2 * B * N * (3 * C * C + C * C + 2 * C * mlp_dim + 2 * N * C)
    transcendentals = B * (heads * N * N + N * mlp_dim)
    bytes_accessed = (2 * (3 * C * C + C * C + 2 * C * mlp_dim)   # bf16 weights
                      + 2 * B * N * C * 4)                        # f32 x in + out

    return pl.pallas_call(
        functools.partial(block_kernel, heads=heads),
        out_shape=jax.ShapeDtypeStruct((B, N, C), jnp.dtype(out_dtype_name)),
        grid=(B,),
        in_specs=in_specs,
        out_specs=pl.BlockSpec((None, N, C), lambda b: (b, 0, 0)),
        scratch_shapes=[pltpu.VMEM((N, C), jnp.bfloat16)],
        compiler_params=pltpu.CompilerParams(
            dimension_semantics=("parallel",),     # batch across both TCs on v7x
            vmem_limit_bytes=_vmem_limit_bytes(N, C, mlp_dim, heads)),
        cost_estimate=pl.CostEstimate(flops=flops,
                                      transcendentals=transcendentals,
                                      bytes_accessed=bytes_accessed),
    )


@functools.partial(jax.jit, static_argnums=2)
def vit_block(x, packed_weights, heads):
    """x: (B, N, C); packed_weights: output of pack_block_weights (reused across calls)."""
    B, N, C = x.shape
    assert C % heads == 0, "dim must be divisible by heads"
    mlp_dim = packed_weights[8].shape[1]        # fc1_w is (C, mlp_dim)
    call = _build_call(B, N, C, mlp_dim, heads, jnp.dtype(x.dtype).name)
    return call(x, *packed_weights)


def ref_block(x, p, heads):
    """Pure-JAX f32 reference mirroring the PyTorch Block forward (eval mode)."""
    B, N, C = x.shape
    hd = C // heads
    scale = hd ** (-0.5)

    def ln(z, w, b):
        mu = jnp.mean(z, axis=-1, keepdims=True)
        var = jnp.mean((z - mu) ** 2, axis=-1, keepdims=True)
        return (z - mu) / jnp.sqrt(var + 1e-5) * w + b

    xn = ln(x, p["ln1_w"], p["ln1_b"])
    qkv = xn @ p["qkv_w"].T + p["qkv_b"]
    qkv = qkv.reshape(B, N, 3, heads, hd).transpose(2, 0, 3, 1, 4)
    q, k, v = qkv[0], qkv[1], qkv[2]
    attn = (q @ jnp.swapaxes(k, -2, -1)) * scale
    attn = jax.nn.softmax(attn, axis=-1)
    y = (attn @ v).transpose(0, 2, 1, 3).reshape(B, N, C)
    y = y @ p["proj_w"].T + p["proj_b"]
    x1 = x + y
    h = ln(x1, p["ln2_w"], p["ln2_b"]) @ p["fc1_w"].T + p["fc1_b"]
    h = jax.nn.gelu(h, approximate=False)
    h = h @ p["fc2_w"].T + p["fc2_b"]
    return x1 + h


if __name__ == "__main__":
    B, N, C = 2, 8, 32
    heads, mlp_dim = 4, 64

    key = jax.random.PRNGKey(0)
    keys = jax.random.split(key, 8)

    x = jax.random.normal(keys[0], (B, N, C), dtype=jnp.float32)

    def rnd(k, shape, scale=0.1):
        return (scale * jax.random.normal(k, shape)).astype(jnp.float32)

    # nn.Linear weights are (out_features, in_features); biases reshaped to (1, out).
    params = {
        "ln1_w": jnp.ones((1, C), jnp.float32),
        "ln1_b": jnp.zeros((1, C), jnp.float32),
        "qkv_w": rnd(keys[1], (3 * C, C)),
        "qkv_b": rnd(keys[2], (1, 3 * C)),
        "proj_w": rnd(keys[3], (C, C)),
        "proj_b": rnd(keys[4], (1, C)),
        "ln2_w": jnp.ones((1, C), jnp.float32),
        "ln2_b": jnp.zeros((1, C), jnp.float32),
        "fc1_w": rnd(keys[5], (mlp_dim, C)),
        "fc1_b": rnd(keys[6], (1, mlp_dim)),
        "fc2_w": rnd(keys[7], (C, mlp_dim)),
        "fc2_b": jnp.zeros((1, C), jnp.float32),
    }

    # Pack weights ONCE (host-side transposes/casts hoisted out of the call path).
    packed = pack_block_weights(params, heads)

    out = vit_block(x, packed, heads)
    out = jax.block_until_ready(out)

    expected = ref_block(x, params, heads)
    # Kernel matmuls use bf16 operands (f32 accumulate) and tanh-GELU vs. the
    # pure-f32 exact-erf reference, hence the slightly looser tolerance.
    np.testing.assert_allclose(np.asarray(out), np.asarray(expected),
                               rtol=2e-2, atol=2e-2)

    print("KERNEL_OK")
</pallas_src>

<mosaic_0001>
module attributes {stable_mosaic.version = 11 : i64} {
  func.func @block_kernel(%arg0: i32, %arg1: memref<1x8x32xf32, #tpu.memory_space<vmem>>, %arg2: memref<1x32xf32, #tpu.memory_space<vmem>>, %arg3: memref<1x32xf32, #tpu.memory_space<vmem>>, %arg4: memref<32x96xbf16, #tpu.memory_space<vmem>>, %arg5: memref<1x96xf32, #tpu.memory_space<vmem>>, %arg6: memref<32x32xbf16, #tpu.memory_space<vmem>>, %arg7: memref<1x32xf32, #tpu.memory_space<vmem>>, %arg8: memref<1x32xf32, #tpu.memory_space<vmem>>, %arg9: memref<1x32xf32, #tpu.memory_space<vmem>>, %arg10: memref<32x64xbf16, #tpu.memory_space<vmem>>, %arg11: memref<1x64xf32, #tpu.memory_space<vmem>>, %arg12: memref<64x32xbf16, #tpu.memory_space<vmem>>, %arg13: memref<1x32xf32, #tpu.memory_space<vmem>>, %arg14: memref<1x8x32xf32, #tpu.memory_space<vmem>>, %arg15: memref<8x32xbf16, #tpu.memory_space<vmem>>) attributes {dimension_semantics = [#tpu.dimension_semantics<parallel>], iteration_bounds = array<i64: 2>, scalar_prefetch = 0 : i64, scratch_operands = 1 : i64, tpu.core_type = #tpu.core_type<tc>, window_params = [{transform_indices = @transform_0, window_bounds = array<i64: 1, 8, 32>}, {pipeline_mode = #tpu.pipeline_mode<synchronous>, transform_indices = @transform_1, window_bounds = array<i64: 1, 32>}, {pipeline_mode = #tpu.pipeline_mode<synchronous>, transform_indices = @transform_2, window_bounds = array<i64: 1, 32>}, {pipeline_mode = #tpu.pipeline_mode<synchronous>, transform_indices = @transform_3, window_bounds = array<i64: 32, 96>}, {pipeline_mode = #tpu.pipeline_mode<synchronous>, transform_indices = @transform_4, window_bounds = array<i64: 1, 96>}, {pipeline_mode = #tpu.pipeline_mode<synchronous>, transform_indices = @transform_5, window_bounds = array<i64: 32, 32>}, {pipeline_mode = #tpu.pipeline_mode<synchronous>, transform_indices = @transform_6, window_bounds = array<i64: 1, 32>}, {pipeline_mode = #tpu.pipeline_mode<synchronous>, transform_indices = @transform_7, window_bounds = array<i64: 1, 32>}, {pipeline_mode = #tpu.pipeline_mode<synchronous>, transform_indices = @transform_8, window_bounds = array<i64: 1, 32>}, {pipeline_mode = #tpu.pipeline_mode<synchronous>, transform_indices = @transform_9, window_bounds = array<i64: 32, 64>}, {pipeline_mode = #tpu.pipeline_mode<synchronous>, transform_indices = @transform_10, window_bounds = array<i64: 1, 64>}, {pipeline_mode = #tpu.pipeline_mode<synchronous>, transform_indices = @transform_11, window_bounds = array<i64: 64, 32>}, {pipeline_mode = #tpu.pipeline_mode<synchronous>, transform_indices = @transform_12, window_bounds = array<i64: 1, 32>}, {transform_indices = @transform_13, window_bounds = array<i64: 1, 8, 32>}]} {
    %c0 = arith.constant 0 : index
    %c0_0 = arith.constant 0 : index
    %c0_1 = arith.constant 0 : index
    %0 = vector.load %arg1[%c0, %c0_0, %c0_1] : memref<1x8x32xf32, #tpu.memory_space<vmem>>, vector<1x8x32xf32>
    %1 = vector.shape_cast %0 : vector<1x8x32xf32> to vector<8x32xf32>
    %c0_2 = arith.constant 0 : index
    %c0_3 = arith.constant 0 : index
    %2 = vector.load %arg2[%c0_2, %c0_3] : memref<1x32xf32, #tpu.memory_space<vmem>>, vector<1x32xf32>
    %c0_4 = arith.constant 0 : index
    %c0_5 = arith.constant 0 : index
    %3 = vector.load %arg3[%c0_4, %c0_5] : memref<1x32xf32, #tpu.memory_space<vmem>>, vector<1x32xf32>
    %cst = arith.constant dense<0.000000e+00> : vector<8xf32>
    %4 = vector.multi_reduction <add>, %1, %cst [1] : vector<8x32xf32> to vector<8xf32>
    %5 = vector.shape_cast %4 : vector<8xf32> to vector<8x1xf32>
    %cst_6 = arith.constant 3.200000e+01 : f32
    %6 = vector.broadcast %cst_6 : f32 to vector<8x1xf32>
    %7 = arith.divf %5, %6 : vector<8x1xf32>
    %8 = vector.broadcast %7 : vector<8x1xf32> to vector<8x32xf32>
    %9 = arith.subf %1, %8 : vector<8x32xf32>
    %10 = arith.mulf %9, %9 : vector<8x32xf32>
    %cst_7 = arith.constant dense<0.000000e+00> : vector<8xf32>
    %11 = vector.multi_reduction <add>, %10, %cst_7 [1] : vector<8x32xf32> to vector<8xf32>
    %12 = vector.shape_cast %11 : vector<8xf32> to vector<8x1xf32>
    %cst_8 = arith.constant 3.200000e+01 : f32
    %13 = vector.broadcast %cst_8 : f32 to vector<8x1xf32>
    %14 = arith.divf %12, %13 : vector<8x1xf32>
    %15 = vector.broadcast %7 : vector<8x1xf32> to vector<8x32xf32>
    %16 = arith.subf %1, %15 : vector<8x32xf32>
    %cst_9 = arith.constant 9.99999974E-6 : f32
    %17 = vector.broadcast %cst_9 : f32 to vector<8x1xf32>
    %18 = arith.addf %14, %17 : vector<8x1xf32>
    %19 = math.rsqrt %18 : vector<8x1xf32>
    %20 = vector.broadcast %19 : vector<8x1xf32> to vector<8x32xf32>
    %21 = arith.mulf %16, %20 : vector<8x32xf32>
    %22 = vector.broadcast %2 : vector<1x32xf32> to vector<8x32xf32>
    %23 = arith.mulf %21, %22 : vector<8x32xf32>
    %24 = vector.broadcast %3 : vector<1x32xf32> to vector<8x32xf32>
    %25 = arith.addf %23, %24 : vector<8x32xf32>
    %26 = arith.truncf %25 : vector<8x32xf32> to vector<8x32xbf16>
    %c0_10 = arith.constant 0 : index
    %c0_11 = arith.constant 0 : index
    %27 = vector.load %arg4[%c0_10, %c0_11] : memref<32x96xbf16, #tpu.memory_space<vmem>>, vector<32x96xbf16>
    %cst_12 = arith.constant dense<0.000000e+00> : vector<8x96xf32>
    %28 = tpu.matmul %26, %27, %cst_12 {dimension_numbers = #tpu.dot_dimension_numbers<[1], [0], [0], [1], [0, 0, 1, 1], [], []>} : vector<8x32xbf16>, vector<32x96xbf16>, vector<8x96xf32> -> vector<8x96xf32>
    %c0_13 = arith.constant 0 : index
    %c0_14 = arith.constant 0 : index
    %29 = vector.load %arg5[%c0_13, %c0_14] : memref<1x96xf32, #tpu.memory_space<vmem>>, vector<1x96xf32>
    %30 = vector.broadcast %29 : vector<1x96xf32> to vector<8x96xf32>
    %31 = arith.addf %28, %30 : vector<8x96xf32>
    %32 = vector.extract_strided_slice %31 {offsets = [0, 0], sizes = [8, 8], strides = [1, 1]} : vector<8x96xf32> to vector<8x8xf32>
    %33 = arith.truncf %32 : vector<8x8xf32> to vector<8x8xbf16>
    %34 = vector.extract_strided_slice %31 {offsets = [0, 32], sizes = [8, 8], strides = [1, 1]} : vector<8x96xf32> to vector<8x8xf32>
    %35 = arith.truncf %34 : vector<8x8xf32> to vector<8x8xbf16>
    %36 = vector.extract_strided_slice %31 {offsets = [0, 64], sizes = [8, 8], strides = [1, 1]} : vector<8x96xf32> to vector<8x8xf32>
    %37 = arith.truncf %36 : vector<8x8xf32> to vector<8x8xbf16>
    %cst_15 = arith.constant dense<0.000000e+00> : vector<8x8xf32>
    %38 = tpu.matmul %33, %35, %cst_15 {dimension_numbers = #tpu.dot_dimension_numbers<[1], [1], [0], [0], [0, 0, 1, 0], [], []>} : vector<8x8xbf16>, vector<8x8xbf16>, vector<8x8xf32> -> vector<8x8xf32>
    %cst_16 = arith.constant dense<0xFF800000> : vector<8xf32>
    %39 = vector.multi_reduction <maximumf>, %38, %cst_16 [1] : vector<8x8xf32> to vector<8xf32>
    %40 = vector.shape_cast %39 : vector<8xf32> to vector<8x1xf32>
    %41 = vector.broadcast %40 : vector<8x1xf32> to vector<8x8xf32>
    %42 = arith.subf %38, %41 : vector<8x8xf32>
    %43 = math.exp %42 : vector<8x8xf32>
    %cst_17 = arith.constant dense<0.000000e+00> : vector<8xf32>
    %44 = vector.multi_reduction <add>, %43, %cst_17 [1] : vector<8x8xf32> to vector<8xf32>
    %45 = vector.shape_cast %44 : vector<8xf32> to vector<8x1xf32>
    %46 = tpu.reciprocal %45 {approx = true} : vector<8x1xf32> -> vector<8x1xf32>
    %47 = vector.broadcast %46 : vector<8x1xf32> to vector<8x8xf32>
    %48 = arith.mulf %43, %47 : vector<8x8xf32>
    %49 = arith.truncf %48 : vector<8x8xf32> to vector<8x8xbf16>
    %cst_18 = arith.constant dense<0.000000e+00> : vector<8x8xf32>
    %50 = tpu.matmul %49, %37, %cst_18 {dimension_numbers = #tpu.dot_dimension_numbers<[1], [0], [0], [1], [0, 0, 1, 1], [], []>} : vector<8x8xbf16>, vector<8x8xbf16>, vector<8x8xf32> -> vector<8x8xf32>
    %51 = arith.truncf %50 : vector<8x8xf32> to vector<8x8xbf16>
    %52 = vector.extract_strided_slice %31 {offsets = [0, 8], sizes = [8, 8], strides = [1, 1]} : vector<8x96xf32> to vector<8x8xf32>
    %53 = arith.truncf %52 : vector<8x8xf32> to vector<8x8xbf16>
    %54 = vector.extract_strided_slice %31 {offsets = [0, 40], sizes = [8, 8], strides = [1, 1]} : vector<8x96xf32> to vector<8x8xf32>
    %55 = arith.truncf %54 : vector<8x8xf32> to vector<8x8xbf16>
    %56 = vector.extract_strided_slice %31 {offsets = [0, 72], sizes = [8, 8], strides = [1, 1]} : vector<8x96xf32> to vector<8x8xf32>
    %57 = arith.truncf %56 : vector<8x8xf32> to vector<8x8xbf16>
    %cst_19 = arith.constant dense<0.000000e+00> : vector<8x8xf32>
    %58 = tpu.matmul %53, %55, %cst_19 {dimension_numbers = #tpu.dot_dimension_numbers<[1], [1], [0], [0], [0, 0, 1, 0], [], []>} : vector<8x8xbf16>, vector<8x8xbf16>, vector<8x8xf32> -> vector<8x8xf32>
    %cst_20 = arith.constant dense<0xFF800000> : vector<8xf32>
    %59 = vector.multi_reduction <maximumf>, %58, %cst_20 [1] : vector<8x8xf32> to vector<8xf32>
    %60 = vector.shape_cast %59 : vector<8xf32> to vector<8x1xf32>
    %61 = vector.broadcast %60 : vector<8x1xf32> to vector<8x8xf32>
    %62 = arith.subf %58, %61 : vector<8x8xf32>
    %63 = math.exp %62 : vector<8x8xf32>
    %cst_21 = arith.constant dense<0.000000e+00> : vector<8xf32>
    %64 = vector.multi_reduction <add>, %63, %cst_21 [1] : vector<8x8xf32> to vector<8xf32>
    %65 = vector.shape_cast %64 : vector<8xf32> to vector<8x1xf32>
    %66 = tpu.reciprocal %65 {approx = true} : vector<8x1xf32> -> vector<8x1xf32>
    %67 = vector.broadcast %66 : vector<8x1xf32> to vector<8x8xf32>
    %68 = arith.mulf %63, %67 : vector<8x8xf32>
    %69 = arith.truncf %68 : vector<8x8xf32> to vector<8x8xbf16>
    %cst_22 = arith.constant dense<0.000000e+00> : vector<8x8xf32>
    %70 = tpu.matmul %69, %57, %cst_22 {dimension_numbers = #tpu.dot_dimension_numbers<[1], [0], [0], [1], [0, 0, 1, 1], [], []>} : vector<8x8xbf16>, vector<8x8xbf16>, vector<8x8xf32> -> vector<8x8xf32>
    %71 = arith.truncf %70 : vector<8x8xf32> to vector<8x8xbf16>
    %72 = vector.extract_strided_slice %31 {offsets = [0, 16], sizes = [8, 8], strides = [1, 1]} : vector<8x96xf32> to vector<8x8xf32>
    %73 = arith.truncf %72 : vector<8x8xf32> to vector<8x8xbf16>
    %74 = vector.extract_strided_slice %31 {offsets = [0, 48], sizes = [8, 8], strides = [1, 1]} : vector<8x96xf32> to vector<8x8xf32>
    %75 = arith.truncf %74 : vector<8x8xf32> to vector<8x8xbf16>
    %76 = vector.extract_strided_slice %31 {offsets = [0, 80], sizes = [8, 8], strides = [1, 1]} : vector<8x96xf32> to vector<8x8xf32>
    %77 = arith.truncf %76 : vector<8x8xf32> to vector<8x8xbf16>
    %cst_23 = arith.constant dense<0.000000e+00> : vector<8x8xf32>
    %78 = tpu.matmul %73, %75, %cst_23 {dimension_numbers = #tpu.dot_dimension_numbers<[1], [1], [0], [0], [0, 0, 1, 0], [], []>} : vector<8x8xbf16>, vector<8x8xbf16>, vector<8x8xf32> -> vector<8x8xf32>
    %cst_24 = arith.constant dense<0xFF800000> : vector<8xf32>
    %79 = vector.multi_reduction <maximumf>, %78, %cst_24 [1] : vector<8x8xf32> to vector<8xf32>
    %80 = vector.shape_cast %79 : vector<8xf32> to vector<8x1xf32>
    %81 = vector.broadcast %80 : vector<8x1xf32> to vector<8x8xf32>
    %82 = arith.subf %78, %81 : vector<8x8xf32>
    %83 = math.exp %82 : vector<8x8xf32>
    %cst_25 = arith.constant dense<0.000000e+00> : vector<8xf32>
    %84 = vector.multi_reduction <add>, %83, %cst_25 [1] : vector<8x8xf32> to vector<8xf32>
    %85 = vector.shape_cast %84 : vector<8xf32> to vector<8x1xf32>
    %86 = tpu.reciprocal %85 {approx = true} : vector<8x1xf32> -> vector<8x1xf32>
    %87 = vector.broadcast %86 : vector<8x1xf32> to vector<8x8xf32>
    %88 = arith.mulf %83, %87 : vector<8x8xf32>
    %89 = arith.truncf %88 : vector<8x8xf32> to vector<8x8xbf16>
    %cst_26 = arith.constant dense<0.000000e+00> : vector<8x8xf32>
    %90 = tpu.matmul %89, %77, %cst_26 {dimension_numbers = #tpu.dot_dimension_numbers<[1], [0], [0], [1], [0, 0, 1, 1], [], []>} : vector<8x8xbf16>, vector<8x8xbf16>, vector<8x8xf32> -> vector<8x8xf32>
    %91 = arith.truncf %90 : vector<8x8xf32> to vector<8x8xbf16>
    %92 = vector.extract_strided_slice %31 {offsets = [0, 24], sizes = [8, 8], strides = [1, 1]} : vector<8x96xf32> to vector<8x8xf32>
    %93 = arith.truncf %92 : vector<8x8xf32> to vector<8x8xbf16>
    %94 = vector.extract_strided_slice %31 {offsets = [0, 56], sizes = [8, 8], strides = [1, 1]} : vector<8x96xf32> to vector<8x8xf32>
    %95 = arith.truncf %94 : vector<8x8xf32> to vector<8x8xbf16>
    %96 = vector.extract_strided_slice %31 {offsets = [0, 88], sizes = [8, 8], strides = [1, 1]} : vector<8x96xf32> to vector<8x8xf32>
    %97 = arith.truncf %96 : vector<8x8xf32> to vector<8x8xbf16>
    %cst_27 = arith.constant dense<0.000000e+00> : vector<8x8xf32>
    %98 = tpu.matmul %93, %95, %cst_27 {dimension_numbers = #tpu.dot_dimension_numbers<[1], [1], [0], [0], [0, 0, 1, 0], [], []>} : vector<8x8xbf16>, vector<8x8xbf16>, vector<8x8xf32> -> vector<8x8xf32>
    %cst_28 = arith.constant dense<0xFF800000> : vector<8xf32>
    %99 = vector.multi_reduction <maximumf>, %98, %cst_28 [1] : vector<8x8xf32> to vector<8xf32>
    %100 = vector.shape_cast %99 : vector<8xf32> to vector<8x1xf32>
    %101 = vector.broadcast %100 : vector<8x1xf32> to vector<8x8xf32>
    %102 = arith.subf %98, %101 : vector<8x8xf32>
    %103 = math.exp %102 : vector<8x8xf32>
    %cst_29 = arith.constant dense<0.000000e+00> : vector<8xf32>
    %104 = vector.multi_reduction <add>, %103, %cst_29 [1] : vector<8x8xf32> to vector<8xf32>
    %105 = vector.shape_cast %104 : vector<8xf32> to vector<8x1xf32>
    %106 = tpu.reciprocal %105 {approx = true} : vector<8x1xf32> -> vector<8x1xf32>
    %107 = vector.broadcast %106 : vector<8x1xf32> to vector<8x8xf32>
    %108 = arith.mulf %103, %107 : vector<8x8xf32>
    %109 = arith.truncf %108 : vector<8x8xf32> to vector<8x8xbf16>
    %cst_30 = arith.constant dense<0.000000e+00> : vector<8x8xf32>
    %110 = tpu.matmul %109, %97, %cst_30 {dimension_numbers = #tpu.dot_dimension_numbers<[1], [0], [0], [1], [0, 0, 1, 1], [], []>} : vector<8x8xbf16>, vector<8x8xbf16>, vector<8x8xf32> -> vector<8x8xf32>
    %111 = arith.truncf %110 : vector<8x8xf32> to vector<8x8xbf16>
    %112 = tpu.concatenate %51, %71, %91, %111 in 1 : vector<8x8xbf16>, vector<8x8xbf16>, vector<8x8xbf16>, vector<8x8xbf16> -> vector<8x32xbf16>
    %c0_31 = arith.constant 0 : index
    %c0_32 = arith.constant 0 : index
    %113 = vector.load %arg15[%c0_31, %c0_32] : memref<8x32xbf16, #tpu.memory_space<vmem>>, vector<8x32xbf16>
    tpu.vector_store %arg15[%c0_31, %c0_32], %112 {strides = array<i32>} : memref<8x32xbf16, #tpu.memory_space<vmem>>, vector<8x32xbf16>,
    %c0_33 = arith.constant 0 : index
    %c0_34 = arith.constant 0 : index
    %114 = vector.load %arg15[%c0_33, %c0_34] : memref<8x32xbf16, #tpu.memory_space<vmem>>, vector<8x32xbf16>
    %c0_35 = arith.constant 0 : index
    %c0_36 = arith.constant 0 : index
    %115 = vector.load %arg6[%c0_35, %c0_36] : memref<32x32xbf16, #tpu.memory_space<vmem>>, vector<32x32xbf16>
    %cst_37 = arith.constant dense<0.000000e+00> : vector<8x32xf32>
    %116 = tpu.matmul %114, %115, %cst_37 {dimension_numbers = #tpu.dot_dimension_numbers<[1], [0], [0], [1], [0, 0, 1, 1], [], []>} : vector<8x32xbf16>, vector<32x32xbf16>, vector<8x32xf32> -> vector<8x32xf32>
    %c0_38 = arith.constant 0 : index
    %c0_39 = arith.constant 0 : index
    %117 = vector.load %arg7[%c0_38, %c0_39] : memref<1x32xf32, #tpu.memory_space<vmem>>, vector<1x32xf32>
    %118 = vector.broadcast %117 : vector<1x32xf32> to vector<8x32xf32>
    %119 = arith.addf %116, %118 : vector<8x32xf32>
    %120 = arith.addf %1, %119 : vector<8x32xf32>
    %c0_40 = arith.constant 0 : index
    %c0_41 = arith.constant 0 : index
    %121 = vector.load %arg8[%c0_40, %c0_41] : memref<1x32xf32, #tpu.memory_space<vmem>>, vector<1x32xf32>
    %c0_42 = arith.constant 0 : index
    %c0_43 = arith.constant 0 : index
    %122 = vector.load %arg9[%c0_42, %c0_43] : memref<1x32xf32, #tpu.memory_space<vmem>>, vector<1x32xf32>
    %cst_44 = arith.constant dense<0.000000e+00> : vector<8xf32>
    %123 = vector.multi_reduction <add>, %120, %cst_44 [1] : vector<8x32xf32> to vector<8xf32>
    %124 = vector.shape_cast %123 : vector<8xf32> to vector<8x1xf32>
    %cst_45 = arith.constant 3.200000e+01 : f32
    %125 = vector.broadcast %cst_45 : f32 to vector<8x1xf32>
    %126 = arith.divf %124, %125 : vector<8x1xf32>
    %127 = vector.broadcast %126 : vector<8x1xf32> to vector<8x32xf32>
    %128 = arith.subf %120, %127 : vector<8x32xf32>
    %129 = arith.mulf %128, %128 : vector<8x32xf32>
    %cst_46 = arith.constant dense<0.000000e+00> : vector<8xf32>
    %130 = vector.multi_reduction <add>, %129, %cst_46 [1] : vector<8x32xf32> to vector<8xf32>
    %131 = vector.shape_cast %130 : vector<8xf32> to vector<8x1xf32>
    %cst_47 = arith.constant 3.200000e+01 : f32
    %132 = vector.broadcast %cst_47 : f32 to vector<8x1xf32>
    %133 = arith.divf %131, %132 : vector<8x1xf32>
    %134 = vector.broadcast %126 : vector<8x1xf32> to vector<8x32xf32>
    %135 = arith.subf %120, %134 : vector<8x32xf32>
    %cst_48 = arith.constant 9.99999974E-6 : f32
    %136 = vector.broadcast %cst_48 : f32 to vector<8x1xf32>
    %137 = arith.addf %133, %136 : vector<8x1xf32>
    %138 = math.rsqrt %137 : vector<8x1xf32>
    %139 = vector.broadcast %138 : vector<8x1xf32> to vector<8x32xf32>
    %140 = arith.mulf %135, %139 : vector<8x32xf32>
    %141 = vector.broadcast %121 : vector<1x32xf32> to vector<8x32xf32>
    %142 = arith.mulf %140, %141 : vector<8x32xf32>
    %143 = vector.broadcast %122 : vector<1x32xf32> to vector<8x32xf32>
    %144 = arith.addf %142, %143 : vector<8x32xf32>
    %145 = arith.truncf %144 : vector<8x32xf32> to vector<8x32xbf16>
    %c0_49 = arith.constant 0 : index
    %c0_50 = arith.constant 0 : index
    %146 = vector.load %arg10[%c0_49, %c0_50] : memref<32x64xbf16, #tpu.memory_space<vmem>>, vector<32x64xbf16>
    %cst_51 = arith.constant dense<0.000000e+00> : vector<8x64xf32>
    %147 = tpu.matmul %145, %146, %cst_51 {dimension_numbers = #tpu.dot_dimension_numbers<[1], [0], [0], [1], [0, 0, 1, 1], [], []>} : vector<8x32xbf16>, vector<32x64xbf16>, vector<8x64xf32> -> vector<8x64xf32>
    %c0_52 = arith.constant 0 : index
    %c0_53 = arith.constant 0 : index
    %148 = vector.load %arg11[%c0_52, %c0_53] : memref<1x64xf32, #tpu.memory_space<vmem>>, vector<1x64xf32>
    %149 = vector.broadcast %148 : vector<1x64xf32> to vector<8x64xf32>
    %150 = arith.addf %147, %149 : vector<8x64xf32>
    %151 = arith.mulf %150, %150 : vector<8x64xf32>
    %152 = arith.mulf %150, %151 : vector<8x64xf32>
    %cst_54 = arith.constant 4.471500e-02 : f32
    %153 = vector.broadcast %cst_54 : f32 to vector<8x64xf32>
    %154 = arith.mulf %153, %152 : vector<8x64xf32>
    %155 = arith.addf %150, %154 : vector<8x64xf32>
    %cst_55 = arith.constant 0.797884583 : f32
    %156 = vector.broadcast %cst_55 : f32 to vector<8x64xf32>
    %157 = arith.mulf %156, %155 : vector<8x64xf32>
    %158 = math.tanh %157 : vector<8x64xf32>
    %cst_56 = arith.constant 1.000000e+00 : f32
    %159 = vector.broadcast %cst_56 : f32 to vector<8x64xf32>
    %160 = arith.addf %159, %158 : vector<8x64xf32>
    %cst_57 = arith.constant 5.000000e-01 : f32
    %161 = vector.broadcast %cst_57 : f32 to vector<8x64xf32>
    %162 = arith.mulf %161, %160 : vector<8x64xf32>
    %163 = arith.mulf %150, %162 : vector<8x64xf32>
    %164 = arith.truncf %163 : vector<8x64xf32> to vector<8x64xbf16>
    %c0_58 = arith.constant 0 : index
    %c0_59 = arith.constant 0 : index
    %165 = vector.load %arg12[%c0_58, %c0_59] : memref<64x32xbf16, #tpu.memory_space<vmem>>, vector<64x32xbf16>
    %cst_60 = arith.constant dense<0.000000e+00> : vector<8x32xf32>
    %166 = tpu.matmul %164, %165, %cst_60 {dimension_numbers = #tpu.dot_dimension_numbers<[1], [0], [0], [1], [0, 0, 1, 1], [], []>} : vector<8x64xbf16>, vector<64x32xbf16>, vector<8x32xf32> -> vector<8x32xf32>
    %c0_61 = arith.constant 0 : index
    %c0_62 = arith.constant 0 : index
    %167 = vector.load %arg13[%c0_61, %c0_62] : memref<1x32xf32, #tpu.memory_space<vmem>>, vector<1x32xf32>
    %168 = vector.broadcast %167 : vector<1x32xf32> to vector<8x32xf32>
    %169 = arith.addf %166, %168 : vector<8x32xf32>
    %170 = arith.addf %120, %169 : vector<8x32xf32>
    %c0_63 = arith.constant 0 : index
    %c0_64 = arith.constant 0 : index
    %c0_65 = arith.constant 0 : index
    %171 = vector.load %arg14[%c0_63, %c0_64, %c0_65] : memref<1x8x32xf32, #tpu.memory_space<vmem>>, vector<1x8x32xf32>
    %172 = vector.shape_cast %171 : vector<1x8x32xf32> to vector<8x32xf32>
    %173 = vector.shape_cast %170 : vector<8x32xf32> to vector<1x8x32xf32>
    tpu.vector_store %arg14[%c0_63, %c0_64, %c0_65], %173 {strides = array<i32>} : memref<1x8x32xf32, #tpu.memory_space<vmem>>, vector<1x8x32xf32>,
    return
  }
  func.func @transform_0(%arg0: i32) -> (i32, i32, i32) {
    %c0_i32 = arith.constant 0 : i32
    %c0_i32_0 = arith.constant 0 : i32
    %c0_i32_1 = arith.constant 0 : i32
    return %arg0, %c0_i32, %c0_i32_0 : i32, i32, i32
  }
  func.func @transform_1(%arg0: i32) -> (i32, i32) {
    %c0_i32 = arith.constant 0 : i32
    %c0_i32_0 = arith.constant 0 : i32
    %c0_i32_1 = arith.constant 0 : i32
    return %c0_i32, %c0_i32_0 : i32, i32
  }
  func.func @transform_2(%arg0: i32) -> (i32, i32) {
    %c0_i32 = arith.constant 0 : i32
    %c0_i32_0 = arith.constant 0 : i32
    %c0_i32_1 = arith.constant 0 : i32
    return %c0_i32, %c0_i32_0 : i32, i32
  }
  func.func @transform_3(%arg0: i32) -> (i32, i32) {
    %c0_i32 = arith.constant 0 : i32
    %c0_i32_0 = arith.constant 0 : i32
    %c0_i32_1 = arith.constant 0 : i32
    return %c0_i32, %c0_i32_0 : i32, i32
  }
  func.func @transform_4(%arg0: i32) -> (i32, i32) {
    %c0_i32 = arith.constant 0 : i32
    %c0_i32_0 = arith.constant 0 : i32
    %c0_i32_1 = arith.constant 0 : i32
    return %c0_i32, %c0_i32_0 : i32, i32
  }
  func.func @transform_5(%arg0: i32) -> (i32, i32) {
    %c0_i32 = arith.constant 0 : i32
    %c0_i32_0 = arith.constant 0 : i32
    %c0_i32_1 = arith.constant 0 : i32
    return %c0_i32, %c0_i32_0 : i32, i32
  }
  func.func @transform_6(%arg0: i32) -> (i32, i32) {
    %c0_i32 = arith.constant 0 : i32
    %c0_i32_0 = arith.constant 0 : i32
    %c0_i32_1 = arith.constant 0 : i32
    return %c0_i32, %c0_i32_0 : i32, i32
  }
  func.func @transform_7(%arg0: i32) -> (i32, i32) {
    %c0_i32 = arith.constant 0 : i32
    %c0_i32_0 = arith.constant 0 : i32
    %c0_i32_1 = arith.constant 0 : i32
    return %c0_i32, %c0_i32_0 : i32, i32
  }
  func.func @transform_8(%arg0: i32) -> (i32, i32) {
    %c0_i32 = arith.constant 0 : i32
    %c0_i32_0 = arith.constant 0 : i32
    %c0_i32_1 = arith.constant 0 : i32
    return %c0_i32, %c0_i32_0 : i32, i32
  }
  func.func @transform_9(%arg0: i32) -> (i32, i32) {
    %c0_i32 = arith.constant 0 : i32
    %c0_i32_0 = arith.constant 0 : i32
    %c0_i32_1 = arith.constant 0 : i32
    return %c0_i32, %c0_i32_0 : i32, i32
  }
  func.func @transform_10(%arg0: i32) -> (i32, i32) {
    %c0_i32 = arith.constant 0 : i32
    %c0_i32_0 = arith.constant 0 : i32
    %c0_i32_1 = arith.constant 0 : i32
    return %c0_i32, %c0_i32_0 : i32, i32
  }
  func.func @transform_11(%arg0: i32) -> (i32, i32) {
    %c0_i32 = arith.constant 0 : i32
    %c0_i32_0 = arith.constant 0 : i32
    %c0_i32_1 = arith.constant 0 : i32
    return %c0_i32, %c0_i32_0 : i32, i32
  }
  func.func @transform_12(%arg0: i32) -> (i32, i32) {
    %c0_i32 = arith.constant 0 : i32
    %c0_i32_0 = arith.constant 0 : i32
    %c0_i32_1 = arith.constant 0 : i32
    return %c0_i32, %c0_i32_0 : i32, i32
  }
  func.func @transform_13(%arg0: i32) -> (i32, i32, i32) {
    %c0_i32 = arith.constant 0 : i32
    %c0_i32_0 = arith.constant 0 : i32
    %c0_i32_1 = arith.constant 0 : i32
    return %arg0, %c0_i32, %c0_i32_0 : i32, i32, i32
  }
}

</mosaic_0001>

<bundles_post_ra>
// kernel: vit_block.1
= control target key start
LH: loop header
LB: loop body
LE: loop exit
PB: predicated region body
PF: predicated region fallthrough
CT: control target
= control target key end

     0   :  { %s2358_s0 = inlined_call_operand.vmem [shape: f32[2,8,32], index: 0, kind: input, shape index: {}]   ;;  %s2359_s1 = inlined_call_operand.vmem [shape: f32[1,32], index: 1, kind: input, shape index: {}]   ;;  %s2360_s2 = inlined_call_operand.vmem [shape: f32[1,32], index: 2, kind: input, shape index: {}]   ;;  %s2361_s3 = inlined_call_operand.vmem [shape: bf16[32,96], index: 3, kind: input, shape index: {}]   ;;  %s2362_s4 = inlined_call_operand.hbm [shape: f32[1,96], index: 4, kind: input, shape index: {}]   ;;  %s2363_s5 = inlined_call_operand.vmem [shape: bf16[32,32], index: 5, kind: input, shape index: {}]   ;;  %s2364_s6 = inlined_call_operand.hbm [shape: f32[1,32], index: 6, kind: input, shape index: {}]   ;;  %s2365_s7 = inlined_call_operand.hbm [shape: f32[1,32], index: 7, kind: input, shape index: {}]   ;;  %s2366_s8 = inlined_call_operand.hbm [shape: f32[1,32], index: 8, kind: input, shape index: {}]   ;;  %s2367_s9 = inlined_call_operand.vmem [shape: bf16[32,64], index: 9, kind: input, shape index: {}]   ;;  %s2368_s10 = inlined_call_operand.vmem [shape: f32[1,64], index: 10, kind: input, shape index: {}]   ;;  %s2369_s11 = inlined_call_operand.vmem [shape: bf16[64,32], index: 11, kind: input, shape index: {}]   ;;  %s2370_s12 = inlined_call_operand.vmem [shape: f32[1,32], index: 12, kind: input, shape index: {}]   ;;  %s2371_s13 = inlined_call_operand.hbm [shape: f32[2,8,32], index: 13, kind: output, shape index: {}]  }
   0x1   :  { %2382 = sst [smem:[#allocation22_spill]] %s2371_s13 }
   0x2   :  { %18 = vsyncpa [#allocation4], 0 }
   0x3   :  { %19 = vsyncpa [#allocation7], 0 }
   0x4   :  { %20 = vsyncpa [#allocation10], 0 }
   0x5   :  { %21 = vsyncpa [#allocation5], 0 }
   0x6   :  { %23 = vsyncpa [#allocation5 + $0x1], 0  ;;  %s1996_s25 = smov 0   ;;  %s1998_s26 = smov 0  }
   0x7   :  { %s2000_s27 = smov 0   ;;  %s2002_s28 = smov 0  }
   0x8 LB: > { %2383 = sst [smem:[#allocation16_spill]] %s1891_s25  ;;  %s2017_s29 = sadd.s32 4294967295, %s1903_s28   ;;  %s1903_s28 = sphi %s2002_s28, %s2407_s28   ;;  %s1899_s27 = sphi %s2000_s27, %s2409_s27   ;;  %s1895_s26 = sphi %s1998_s26, %s2411_s26   ;;  %s1891_s25 = sphi %s1996_s25, %s2410_s25  }
   0x9   : > { %2384 = sst [smem:[#allocation17_spill]] %s1899_s27  ;;  %s1427_s30 = sadd.s32 4294967294, %s1903_s28  }
   0xa   : > { %2385 = sst [smem:[#allocation18_spill]] %s1903_s28  ;;  %s2021_s14 = sadd.s32 1, %s1903_s28  }
   0xb   : > { %2386 = sst [smem:[#allocation19_spill]] %s2021_s14  ;;  %s314_s15 = sadd.s32 1, %s1899_s27 }
   0xc   : > { %s311_s16 = ssub.s32 %s1903_s28, %s2021_s14  ;;  %p324_p0 = scmp.ne.s32.totalorder %s1899_s27, %s1895_s26 }
   0xd   : > { %p312_p1 = scmp.eq.s32.totalorder %s311_s16, 0  ;;  %p325_p2 = scmp.eq.s32.totalorder %s2017_s29, 1 }
   0xe   : > { %p330_p3 = scmp.ne.s32.totalorder %s1895_s26, %s1891_s25  ;;  %p331_p4 = scmp.eq.s32.totalorder %s1427_s30, 1 }
   0xf   : > { %s2032_s17 = scalar_select %p312_p1, %s1899_s27, %s314_s15  }
  0x10   : > { %p2034_p5 = por %p325_p2, %p324_p0  ;;  %p2038_p6 = por %p331_p4, %p330_p3 }
  0x11   : > { %2387 = sst [smem:[#allocation20_spill]] %s2032_s17  ;;  %p1428_p7 = scmp.ge.s32.totalorder %s1903_s28, 1 }
  0x12   : > { %s2388_s18 = scalar_select %p2034_p5, 1, 0 }
  0x13   : > { %s2389_s19 = scalar_select %p2038_p6, 1, 0 }
  0x14   : > { %p338_p8 = scmp.lt.s32.totalorder %s1903_s28, 3  ;;  %p2377_p9 = scmp.eq.s32.totalorder %s2017_s29, 0 }
  0x15   : > { %2390 = sst [smem:[#allocation21_spill]] %s2389_s19  ;;  %s1905_s21 = smov [#allocation6]  }
  0x16   : > { %p2045_p10 = pnand %p1428_p7, %p338_p8  ;;  %s374_s22 = sshll.u32 %s1905_s21, 4  ;;  %s375_s22 = int_to_ptr.vmem [resolvable:$true] %s374_s22 }
  0x17   : > { %s1906_s23 = smov [#allocation3]   ;;  %s1907_s15 = smov [#allocation8]  }
  0x18   : > { %s2391_s20 = scalar_select %p2045_p10, 1, 0 }
  0x19   : > { %p1607_p11 = pneg %p2045_p10  ;;  %s360_s24 = sshll.u32 %s1906_s23, 4  ;;  %s2057_s24 = int_to_ptr.vmem [resolvable:$true] %s360_s24 }
  0x1a   : > { %s385_s16 = sshll.u32 %s1907_s15, 4  ;;  %s1717_s21 = scalar_lea.hbm %s2364_s6, 16  ;;  %s2059_s16 = int_to_ptr.vmem [resolvable:$true] %s385_s16 }
  0x1b   : > { %p2053_p12 = pnand %p2377_p9, %p1607_p11  ;;  %p1718_p13 = scmp.ne.s32.totalorder %s2364_s6, %s1717_s21 }
  0x1c   : > { %p1724_p3 = scmp.lt.u32.totalorder %s1717_s21, %s2364_s6 }
  0x1d   : > { %p2069_p0 = pneg %p2053_p12 }
  0x1f   : > { %p1720_p1 = pnand %p2069_p0, %p1718_p13 }
  0x21   : > { %p1721_p2 = pneg %p1720_p1 }
  0x23   : > { %p1726_p4 = pnand %p1724_p3, %p1721_p2 }
  0x25   : > { %1729 = shalt.err (!%p1726_p4)
}
  0x26   : > { %s1730_s27 = scalar_lea.vmem %s375_s22, 16  ;;  %s1737_s14 = scalar_lea.vmem %s375_s22, 32 }
  0x27   : > { %p1731_p7 = scmp.ne.s32.totalorder %s375_s22, %s1730_s27  ;;  %p1738_p9 = scmp.lt.s32.totalorder %s375_s22, %s375_s22 }
  0x28   : > { %p1739_p6 = scmp.lt.s32.totalorder %s1737_s14, %s1730_s27 }
  0x29   : > { %p1733_p8 = pnand %p1731_p7, %p2069_p0 }
  0x2a   : > { %p1740_p5 = por %p1739_p6, %p1738_p9 }
  0x2b   : > { %p1734_p11 = pneg %p1733_p8 }
  0x2d   : > { %p1741_p10 = pnand %p1740_p5, %p1734_p11 }
  0x2f   : > { %1744 = shalt.err (!%p1741_p10)
}
  0x30   : > { %1613 = dma.hbm_to_vmem [thread:$0]  (!%p2053_p12), %s2364_s6, 16, %s375_s22, [#allocation7]  }
  0x31   : > { %s1745_s15 = scalar_lea.hbm %s2362_s4, 16 }
  0x32   : > { %p1746_p13 = scmp.ne.s32.totalorder %s2362_s4, %s1745_s15  ;;  %p1752_p5 = scmp.lt.u32.totalorder %s1745_s15, %s2362_s4 }
  0x34   : > { %p1748_p1 = pnand %p1746_p13, %p2069_p0 }
  0x36   : > { %p1749_p6 = pneg %p1748_p1 }
  0x38   : > { %p1754_p9 = pnand %p1752_p5, %p1749_p6 }
  0x3a   : > { %1757 = shalt.err (!%p1754_p9)
}
  0x3b   : > { %s1758_s22 = scalar_lea.vmem %s2057_s24, 16  ;;  %s1765_s13 = scalar_lea.vmem %s2057_s24, 32 }
  0x3c   : > { %p1759_p10 = scmp.ne.s32.totalorder %s2057_s24, %s1758_s22  ;;  %p1766_p4 = scmp.lt.s32.totalorder %s2057_s24, %s2057_s24 }
  0x3d   : > { %p1767_p7 = scmp.lt.s32.totalorder %s1765_s13, %s1758_s22 }
  0x3e   : > { %p1761_p2 = pnand %p1759_p10, %p2069_p0 }
  0x3f   : > { %p1768_p8 = por %p1767_p7, %p1766_p4 }
  0x40   : > { %p1762_p3 = pneg %p1761_p2 }
  0x42   : > { %p1769_p11 = pnand %p1768_p8, %p1762_p3 }
  0x44   : > { %1772 = shalt.err (!%p1769_p11)
}
  0x45   : > { %1610 = dma.hbm_to_vmem [thread:$0]  (!%p2053_p12), %s2362_s4, 16, %s2057_s24, [#allocation4]  }
  0x46   : > { %s1773_s21 = scalar_lea.hbm %s2365_s7, 16 }
  0x47   : > { %p1774_p13 = scmp.ne.s32.totalorder %s2365_s7, %s1773_s21  ;;  %p1780_p5 = scmp.lt.u32.totalorder %s1773_s21, %s2365_s7 }
  0x49   : > { %p1776_p1 = pnand %p1774_p13, %p2069_p0 }
  0x4b   : > { %p1777_p6 = pneg %p1776_p1 }
  0x4d   : > { %p1782_p9 = pnand %p1780_p5, %p1777_p6 }
  0x4f   : > { %1785 = shalt.err (!%p1782_p9)
}
  0x50   : > { %s1786_s24 = scalar_lea.vmem %s2059_s16, 16  ;;  %s1793_s13 = scalar_lea.vmem %s2059_s16, 32 }
  0x51   : > { %p1787_p10 = scmp.ne.s32.totalorder %s2059_s16, %s1786_s24  ;;  %p1794_p4 = scmp.lt.s32.totalorder %s2059_s16, %s2059_s16 }
  0x52   : > { %p1795_p7 = scmp.lt.s32.totalorder %s1793_s13, %s1786_s24 }
  0x53   : > { %p1789_p2 = pnand %p1787_p10, %p2069_p0 }
  0x54   : > { %p1796_p8 = por %p1795_p7, %p1794_p4 }
  0x55   : > { %p1790_p3 = pneg %p1789_p2 }
  0x57   : > { %p1797_p11 = pnand %p1796_p8, %p1790_p3 }
  0x59   : > { %1800 = shalt.err (!%p1797_p11)
}
  0x5a   : > { %1616 = dma.hbm_to_vmem [thread:$0]  (!%p2053_p12), %s2365_s7, 16, %s2059_s16, [#allocation7]  }
  0x5b   : > { %s1908_s19 = smov [#allocation9]   ;;  %s1801_s27 = scalar_lea.hbm %s2366_s8, 16 }
  0x5c   : > { %s396_s25 = sshll.u32 %s1908_s19, 4  ;;  %p1802_p13 = scmp.ne.s32.totalorder %s2366_s8, %s1801_s27  ;;  %s397_s25 = int_to_ptr.vmem [resolvable:$true] %s396_s25 }
  0x5d   : > { %p1808_p5 = scmp.lt.u32.totalorder %s1801_s27, %s2366_s8 }
  0x5e   : > { %p1804_p1 = pnand %p1802_p13, %p2069_p0 }
  0x60   : > { %p1805_p6 = pneg %p1804_p1 }
  0x62   : > { %p1810_p9 = pnand %p1808_p5, %p1805_p6 }
  0x64   : > { %1813 = shalt.err (!%p1810_p9)
}
  0x65   : > { %s1814_s16 = scalar_lea.vmem %s397_s25, 16  ;;  %s1821_s28 = scalar_lea.vmem %s397_s25, 32 }
  0x66   : > { %p1815_p10 = scmp.ne.s32.totalorder %s397_s25, %s1814_s16  ;;  %p1822_p4 = scmp.lt.s32.totalorder %s397_s25, %s397_s25 }
  0x67   : > { %p1823_p7 = scmp.lt.s32.totalorder %s1821_s28, %s1814_s16 }
  0x68   : > { %p1817_p2 = pnand %p1815_p10, %p2069_p0 }
  0x69   : > { %p1824_p8 = por %p1823_p7, %p1822_p4 }
  0x6a   : > { %p1818_p3 = pneg %p1817_p2 }
  0x6c   : > { %p1825_p11 = pnand %p1824_p8, %p1818_p3 }
  0x6e   : > { %1828 = shalt.err (!%p1825_p11)
}
  0x6f   : > { %1619 = dma.hbm_to_vmem [thread:$0]  (!%p2053_p12), %s2366_s8, 16, %s397_s25, [#allocation10]  }
  0x70   : > { %p2394_p13 = scmp.ne.s32.totalorder %s2391_s20, 0 }
  0x71   : > { %p2395_p1 = scmp.eq.s32.totalorder (!%p2394_p13), %s2017_s29, 0 }
  0x72   : > { %428 = sbr.rel (%p2394_p13) target bundleno = 2721 (0xaa1), region = 72 }
  0x79   : > { %1874 = dma.done.wait (%p2395_p1), [#allocation4], 16   ;;  %p2396_p0 = pmov %p2395_p1 }
  0x7b   : > { %1876 = vsyncadd (%p2396_p0), [#allocation4], 4294967280  ;;  %p2397_p6 = pmov %p2396_p0 }
  0x7c   : > { %p2398_p5 = pmov %p2396_p0 }
  0x7d   : > { %1878 = dma.done.wait (%p2397_p6), [#allocation7], 32  }
  0x7e   : > { %1880 = vsyncadd (%p2398_p5), [#allocation7], 4294967264  ;;  %p2399_p9 = pmov %p2396_p0 }
  0x7f   : > { %p2400_p12 = pmov %p2396_p0 }
  0x80   : > { %1882 = dma.done.wait (%p2399_p9), [#allocation10], 16  }
  0x81   : > { %1884 = vsyncadd (%p2400_p12), [#allocation10], 4294967280  ;;  %p483_p10 = scmp.lt.s32.totalorder %s2017_s29, 1  ;;  %vm491_vm0 = vcmask 261120   ;;  %v1685_v7 = vld [vmem:[%s2361_s3] sm:$0xff]   ;;  %v1909_v8 = vmov 0.0  }
  0x82   : > { %1505 = vmatprep.subr.bf16.mxu0 %v1909_v8  ;;  %vm1910_vm1 = vmmov 0   ;;  %v1686_v9 = vld [vmem:[%s2361_s3 + $0x8] sm:$0xff]   ;;  %1513 = vmatprep.subr.bf16.mxu1 %v1909_v8  ;;  %v1441_v14 = vld [vmem:[%s2359_s1] ss:$0 sm:$0xff]  ;;  %v1443_v20 = vld [vmem:[#allocation3] ss:$0 sm:$0xff] }
  0x83   : > { %s484_s20 = scalar_select %p483_p10, %s2017_s29, 1  ;;  %1509 = vmatprep.mubr.msk.bf16.mxu0 %vm1910_vm1, %v1909_v8  ;;  %1506 = vmatpush3.bf16.msra.mxu0 %v1685_v7  ;;  %v1442_v16 = vld [vmem:[%s2360_s2] ss:$0 sm:$0xff]  ;;  %vm591_vm2 = vcmask 64512   ;;  %vm655_vm3 = vcmask 1043456   ;;  %vm1045_vm4 = vcmask 130048  }
  0x84   : > { %1507 = vmatprep.subr.bf16.mxu0 %v1909_v8  ;;  %1515 = vmatprep.mubr.msk.bf16.mxu1 %vm1910_vm1, %v1909_v8  ;;  %s1911_s17 = smov 120   ;;  %s1912_s19 = smov 96   ;;  %vm1048_vm5 = vcmask 195584   ;;  %vm1052_vm6 = vcmask 257024   ;;  %vm1267_vm7 = vcmask 523264  }
  0x85   : > { %s1440_s30 = sshll.u32 %s484_s20, 3  ;;  %s1913_s20 = smov 88  }
  0x86   : > { %s486_s21 = scalar_lea.vmem %s2358_s0, %s1440_s30  ;;  %s1914_s30 = smov 80  }
  0x87   : > { %v2170_v0 = vld [vmem:[%s486_s21] sm:$0xff]  ;;  %1508 = vmatpush3.bf16.msra.mxu0 %v1686_v9  ;;  %s1915_s23 = smov 112   ;;  %s1916_s25 = smov 72  }
  0x88   : > { %v492_v1 = vsel %vm491_vm0, %v2170_v0, 0.0  ;;  %1519 = vmatprep.subr.bf16.mxu0 %v1909_v8  ;;  %s1917_s21 = smov 104   ;;  %s1918_s15 = smov 64  }
  0x89   : > { %493 = vadd.xlane.f32.xlu0 %v492_v1  ;;  %s1919_s27 = smov 56   ;;  %s1920_s14 = smov 48  }
  0x8a   : > { %s1921_s22 = smov 40   ;;  %s1922_s24 = smov 8  }
  0x8b   : > { %p2402_p3 = scmp.ne.s32.totalorder %s2388_s18, 0  ;;  %s1925_s28 = smov [#allocation11]  }
 0x116   : > { %v494_v2 = vpop.xlane.xlu0 %493 }
 0x117   : > { %v496_v3 = vmul.f32 0.03125, %v494_v2 }
 0x119   : > { %v497_v4 = vsub.f32 %v2170_v0, %v496_v3 }
 0x11b   : > { %v498_v5 = vmul.f32 %v497_v4, %v497_v4 }
 0x11d   : > { %v499_v6 = vsel %vm491_vm0, %v498_v5, 0.0 }
 0x11e   : > { %500 = vadd.xlane.f32.xlu0 %v499_v6 }
 0x1ab   : > { %v501_v10 = vpop.xlane.xlu0 %500 }
 0x1ac   : > { %v502_v11 = vmul.f32 0.03125, %v501_v10 }
 0x1ae   : > { %v503_v12 = vadd.f32 1e-05, %v502_v11 }
 0x1b0   : > { %1695 = vrsqrt.f32 %v503_v12 }
 0x1ba   : > { %v1696_v13 = vpop.eup %1695 }
 0x1bb   : > { %v505_v15 = vmul.f32 %v1696_v13, %v497_v4 }
 0x1bd   : > { %v512_v17 = vmul.f32 %v1441_v14, %v505_v15 }
 0x1bf   : > { %v519_v18 = vadd.f32 %v1442_v16, %v512_v17 }
 0x1c1   : > { %v520_v19 = vpack.c.bf16 %v519_v18, %v519_v18 }
 0x1c3   : > { %1510 = vmatmul.mubr.msk.bf16.vlgmr.msra.gmra.mrb[0].mxu0 %vm491_vm0, %v520_v19 }
 0x1c4   : > { %1521 = vmatprep.mubr.msk.bf16.mxu0 %vm1910_vm1, %v1909_v8 }
 0x296   : > { %v581_v21 = vpop.f32.mrb[0].mxu0 }
 0x297   : > { %v582_v22 = vadd.f32 %v1443_v20, %v581_v21  ;;  %v1511_v23 = vpop.f32.mrb[1].mxu0 }
 0x298   : > { %v584_v24 = vpop.f32.mrb[2].mxu0 }
 0x299   : > { %v2199_v25 = vpack.c.bf16 %v582_v22, %v582_v22  ;;  %v1512_v26 = vpop.f32.mrb[3].mxu0 }
 0x29b   : > { %700 = vrot.lane.b32.xlu0 %v2199_v25, %s1911_s17  ;;  %589 = vrot.lane.b32.xlu1 %v2199_v25, %s1912_s19  ;;  %s1923_s19 = smov 16   ;;  %s1833_s17 = sshll.u32 %s1925_s28, 4  ;;  %s1834_s17 = int_to_ptr.vmem [resolvable:$false] %s1833_s17 }
 0x29f   : > { %702 = vrot.lane.b32.xlu1 %v2199_v25, %s1913_s20  ;;  %s1924_s20 = smov 24  }
 0x2a3   : > { %813 = vrot.lane.b32.xlu1 %v2199_v25, %s1914_s30 }
 0x2a7   : > { %811 = vrot.lane.b32.xlu1 %v2199_v25, %s1915_s23 }
 0x2ab   : > { %924 = vrot.lane.b32.xlu1 %v2199_v25, %s1916_s25 }
 0x2af   : > { %922 = vrot.lane.b32.xlu1 %v2199_v25, %s1917_s21  ;;  %s1472_s21 = sshll.u32 %s2017_s29, 7 }
 0x30d   : > { %v590_v27 = vpop.permute.xlu1 %589  ;;  %v701_v32 = vpop.permute.xlu0 %700 }
 0x30e   : > { %v596_v28 = vsel %vm591_vm2, %v590_v27, 0 }
 0x30f   : > { %1514 = vmatpush3.bf16.xpose.msra.mxu1 %v596_v28 }
 0x310   : > { %1525 = vmatprep.subr.bf16.mxu1 %v1909_v8 }
 0x311   : > { %v703_v29 = vpop.permute.xlu1 %702 }
 0x312   : > { %v708_v30 = vsel %vm591_vm2, %v703_v29, 0 }
 0x315   : > { %v814_v31 = vpop.permute.xlu1 %813 }
 0x316   : > { %1516 = vmatmul.mubr.msk.bf16.vlgmr.msra.gmra.mrb[0].mxu1 %vm591_vm2, %v2199_v25  ;;  %v819_v34 = vsel %vm591_vm2, %v814_v31, 0 }
 0x317   : > { %1526 = vmatpush3.bf16.xpose.msra.mxu1 %v708_v30  ;;  %1527 = vmatprep.mubr.msk.bf16.mxu1 %vm1910_vm1, %v1909_v8 }
 0x318   : > { %1537 = vmatprep.subr.bf16.mxu1 %v1909_v8 }
 0x319   : > { %v812_v33 = vpop.permute.xlu1 %811 }
 0x31d   : > { %v925_v35 = vpop.permute.xlu1 %924 }
 0x31e   : > { %1528 = vmatmul.mubr.msk.bf16.vlgmr.msra.gmra.mrb[4].mxu1 %vm591_vm2, %v701_v32  ;;  %v930_v36 = vsel %vm591_vm2, %v925_v35, 0 }
 0x31f   : > { %1538 = vmatpush3.bf16.xpose.msra.mxu1 %v819_v34  ;;  %1539 = vmatprep.mubr.msk.bf16.mxu1 %vm1910_vm1, %v1909_v8 }
 0x320   : > { %1549 = vmatprep.subr.bf16.mxu1 %v1909_v8 }
 0x321   : > { %v923_v37 = vpop.permute.xlu1 %922 }
 0x326   : > { %1540 = vmatmul.mubr.msk.bf16.vlgmr.msra.gmra.mrb[8].mxu1 %vm591_vm2, %v812_v33 }
 0x327   : > { %1550 = vmatpush3.bf16.xpose.msra.mxu1 %v930_v36  ;;  %1551 = vmatprep.mubr.msk.bf16.mxu1 %vm1910_vm1, %v1909_v8 }
 0x328   : > { %1561 = vmatprep.subr.bf16.mxu1 %v1909_v8 }
 0x32e   : > { %1552 = vmatmul.mubr.msk.bf16.vlgmr.msra.gmra.mrb[12].mxu1 %vm591_vm2, %v923_v37 }
 0x32f   : > { %1565 = vmatprep.mubr.msk.bf16.mxu1 %vm1910_vm1, %v1909_v8 }
 0x3e9   : > { %v632_v38 = vpop.f32.mrb[0].mxu1 }
 0x3ea   : > { %v1517_v39 = vpop.f32.mrb[1].mxu1  ;;  %v638_v40 = vsel %vm591_vm2, %v632_v38, -inf }
 0x3eb   : > { %639 = vmax.xlane.f32.xlu1 %v638_v40  ;;  %v635_v41 = vpop.f32.mrb[2].mxu1 }
 0x3ec   : > { %v1518_v42 = vpop.f32.mrb[3].mxu1 }
 0x3f1   : > { %v744_v43 = vpop.f32.mrb[4].mxu1 }
 0x3f2   : > { %v1529_v44 = vpop.f32.mrb[5].mxu1  ;;  %v750_v45 = vsel %vm591_vm2, %v744_v43, -inf }
 0x3f3   : > { %751 = vmax.xlane.f32.xlu0 %v750_v45  ;;  %v747_v46 = vpop.f32.mrb[6].mxu1 }
 0x3f4   : > { %v1530_v47 = vpop.f32.mrb[7].mxu1 }
 0x3f9   : > { %v855_v48 = vpop.f32.mrb[8].mxu1 }
 0x3fa   : > { %v1541_v49 = vpop.f32.mrb[9].mxu1  ;;  %v861_v50 = vsel %vm591_vm2, %v855_v48, -inf }
 0x3fb   : > { %862 = vmax.xlane.f32.xlu1 %v861_v50  ;;  %v858_v51 = vpop.f32.mrb[10].mxu1  ;;  %v1687_v49 = vld [vmem:[%s2363_s5] sm:$0xff]  }
 0x3fc   : > { %v1542_v52 = vpop.f32.mrb[11].mxu1  ;;  %1562 = vmatpush3.bf16.msra.mxu1 %v1687_v49 }
 0x3fd   : > { %1563 = vmatprep.subr.bf16.mxu1 %v1909_v8 }
 0x401   : > { %v966_v53 = vpop.f32.mrb[12].mxu1 }
 0x402   : > { %v1553_v54 = vpop.f32.mrb[13].mxu1  ;;  %v972_v55 = vsel %vm591_vm2, %v966_v53, -inf }
 0x403   : > { %973 = vmax.xlane.f32.xlu0 %v972_v55  ;;  %v969_v56 = vpop.f32.mrb[14].mxu1 }
 0x404   : > { %v1554_v57 = vpop.f32.mrb[15].mxu1 }
 0x478   : > { %v640_v58 = vpop.xlane.xlu1 %639 }
 0x479   : > { %v641_v59 = vsub.f32 %v632_v38, %v640_v58 }
 0x47b   : > { %v642_v60 = vmul.f32 1.442695, %v641_v59 }
 0x47d   : > { %1697 = vpow2.f32 %v642_v60 }
 0x480   : > { %v752_v61 = vpop.xlane.xlu0 %751 }
 0x481   : > { %v753_v62 = vsub.f32 %v744_v43, %v752_v61 }
 0x483   : > { %v754_v63 = vmul.f32 1.442695, %v753_v62 }
 0x485   : > { %1699 = vpow2.f32 %v754_v63 }
 0x487   : > { %v1698_v1 = vpop.eup %1697 }
 0x488   : > { %v644_v2 = vsel %vm591_vm2, %v1698_v1, 0.0  ;;  %v863_v11 = vpop.xlane.xlu1 %862 }
 0x489   : > { %645 = vadd.xlane.f32.xlu1 %v644_v2  ;;  %v864_v12 = vsub.f32 %v855_v48, %v863_v11 }
 0x48b   : > { %v865_v13 = vmul.f32 1.442695, %v864_v12 }
 0x48f   : > { %v1700_v3 = vpop.eup %1699 }
 0x490   : > { %v974_v4 = vpop.xlane.xlu0 %973  ;;  %v756_v5 = vsel %vm591_vm2, %v1700_v3, 0.0 }
 0x491   : > { %v975_v6 = vsub.f32 %v966_v53, %v974_v4  ;;  %757 = vadd.xlane.f32.xlu0 %v756_v5  ;;  %v1688_v53 = vld [vmem:[%s2363_s5 + $0x8] sm:$0xff]  }
 0x492   : > { %1564 = vmatpush3.bf16.msra.mxu1 %v1688_v53 }
 0x493   : > { %v976_v7 = vmul.f32 1.442695, %v975_v6  ;;  %1577 = vmatprep.subr.bf16.mxu1 %v1909_v8  ;;  %v1455_v6 = vld [vmem:[#allocation6] ss:$0 sm:$0xff] }
 0x495   : > { %1701 = vpow2.f32 %v976_v7 }
 0x496   : > { %1703 = vpow2.f32 %v865_v13 }
 0x49a   : > { %650 = vrot.lane.b32.xlu1 %v2199_v25, %s1918_s15 }
 0x49f   : > { %v1702_v9 = vpop.eup %1701 }
 0x4a0   : > { %v978_v10 = vsel %vm591_vm2, %v1702_v9, 0.0  ;;  %v1704_v14 = vpop.eup %1703 }
 0x4a1   : > { %979 = vadd.xlane.f32.xlu0 %v978_v10  ;;  %v867_v15 = vsel %vm591_vm2, %v1704_v14, 0.0 }
 0x4b7   : > { %762 = vrot.lane.b32.xlu0 %v2199_v25, %s1919_s27 }
 0x4be   : > { %868 = vadd.xlane.f32.xlu1 %v867_v15 }
 0x4cf   : > { %873 = vrot.lane.b32.xlu1 %v2199_v25, %s1920_s14 }
 0x4d3   : > { %984 = vrot.lane.b32.xlu1 %v2199_v25, %s1921_s22 }
 0x516   : > { %v646_v16 = vpop.xlane.xlu1 %645 }
 0x517   : > { %1705 = vrcp.f32 %v646_v16 }
 0x51a   : > { %v651_v17 = vpop.permute.xlu1 %650 }
 0x51b   : > { %v657_v18 = vsel %vm655_vm3, %v651_v17, 0 }
 0x51c   : > { %1520 = vmatpush3.bf16.msra.mxu0 %v657_v18 }
 0x51d   : > { %1531 = vmatprep.subr.bf16.mxu0 %v1909_v8 }
 0x51e   : > { %v758_v20 = vpop.xlane.xlu0 %757 }
 0x51f   : > { %1707 = vrcp.f32 %v758_v20  ;;  %v1689_v20 = vld [vmem:[%s2367_s9] sm:$0xff]  }
 0x521   : > { %v1706_v19 = vpop.eup %1705 }
 0x522   : > { %v648_v21 = vmul.f32 %v1706_v19, %v1698_v1 }
 0x524   : > { %v649_v22 = vpack.c.bf16 %v648_v21, %v648_v21 }
 0x526   : > { %1522 = vmatmul.mubr.msk.bf16.vlgmr.msra.gmra.mrb[4].mxu0 %vm591_vm2, %v649_v22 }
 0x527   : > { %1533 = vmatprep.mubr.msk.bf16.mxu0 %vm1910_vm1, %v1909_v8 }
 0x529   : > { %v1708_v23 = vpop.eup %1707 }
 0x52a   : > { %v760_v25 = vmul.f32 %v1708_v23, %v1700_v3 }
 0x52c   : > { %v761_v28 = vpack.c.bf16 %v760_v25, %v760_v25  ;;  %v1459_v25 = vld [vmem:[#allocation8] ss:$0 sm:$0xff] }
 0x52e   : > { %v980_v24 = vpop.xlane.xlu0 %979 }
 0x532   : > { %v763_v26 = vpop.permute.xlu0 %762 }
 0x533   : > { %v768_v27 = vsel %vm655_vm3, %v763_v26, 0 }
 0x534   : > { %1532 = vmatpush3.bf16.msra.mxu0 %v768_v27  ;;  %v1460_v27 = vld [vmem:[#allocation9] ss:$0 sm:$0xff] }
 0x535   : > { %1543 = vmatprep.subr.bf16.mxu0 %v1909_v8 }
 0x537   : > { %1534 = vmatmul.mubr.msk.bf16.vlgmr.msra.gmra.mrb[8].mxu0 %vm591_vm2, %v761_v28 }
 0x538   : > { %1545 = vmatprep.mubr.msk.bf16.mxu0 %vm1910_vm1, %v1909_v8 }
 0x54b   : > { %v869_v29 = vpop.xlane.xlu1 %868 }
 0x54c   : > { %1709 = vrcp.f32 %v869_v29 }
 0x54d   : > { %1711 = vrcp.f32 %v980_v24 }
 0x54f   : > { %v874_v30 = vpop.permute.xlu1 %873 }
 0x550   : > { %v879_v31 = vsel %vm655_vm3, %v874_v30, 0 }
 0x551   : > { %1544 = vmatpush3.bf16.msra.mxu0 %v879_v31  ;;  %v1691_v31 = vld [vmem:[%s2369_s11] sm:$0xff]  }
 0x552   : > { %1555 = vmatprep.subr.bf16.mxu0 %v1909_v8 }
 0x553   : > { %v985_v34 = vpop.permute.xlu1 %984 }
 0x554   : > { %v990_v37 = vsel %vm655_vm3, %v985_v34, 0  ;;  %v1694_v34 = vld [vmem:[%s2369_s11 + $0x18] sm:$0xff]  }
 0x556   : > { %v1710_v32 = vpop.eup %1709 }
 0x557   : > { %v871_v33 = vmul.f32 %v1710_v32, %v1704_v14  ;;  %v1712_v36 = vpop.eup %1711  ;;  %v1692_v32 = vld [vmem:[%s2369_s11 + $0x8] sm:$0xff]  }
 0x558   : > { %v982_v38 = vmul.f32 %v1712_v36, %v1702_v9 }
 0x559   : > { %v872_v35 = vpack.c.bf16 %v871_v33, %v871_v33  ;;  %v1693_v33 = vld [vmem:[%s2369_s11 + $0x10] sm:$0xff]  }
 0x55a   : > { %v983_v39 = vpack.c.bf16 %v982_v38, %v982_v38 }
 0x55b   : > { %1546 = vmatmul.mubr.msk.bf16.vlgmr.msra.gmra.mrb[12].mxu0 %vm591_vm2, %v872_v35  ;;  %v1461_v35 = vld [vmem:[%s2368_s10] ss:$0 sm:$0xff] }
 0x55c   : > { %1556 = vmatpush3.bf16.msra.mxu0 %v990_v37  ;;  %1557 = vmatprep.mubr.msk.bf16.mxu0 %vm1910_vm1, %v1909_v8 }
 0x55d   : > { %1569 = vmatprep.subr.bf16.mxu0 %v1909_v8 }
 0x563   : > { %1558 = vmatmul.mubr.msk.bf16.vlgmr.msra.gmra.mrb[16].mxu0 %vm591_vm2, %v983_v39 }
 0x564   : > { %1573 = vmatprep.mubr.msk.bf16.mxu0 %vm1910_vm1, %v1909_v8  ;;  %1570 = vmatpush3.bf16.msra.mxu0 %v1689_v20 }
 0x565   : > { %1571 = vmatprep.subr.bf16.mxu0 %v1909_v8 }
 0x5f9   : > { %v693_v40 = vpop.f32.mrb[4].mxu0 }
 0x5fa   : > { %v1523_v41 = vpop.f32.mrb[5].mxu0  ;;  %v699_v62 = vpack.c.bf16 %v693_v40, %v693_v40 }
 0x5fb   : > { %v696_v42 = vpop.f32.mrb[6].mxu0 }
 0x5fc   : > { %v1524_v43 = vpop.f32.mrb[7].mxu0 }
 0x60a   : > { %v804_v44 = vpop.f32.mrb[8].mxu0 }
 0x60b   : > { %v810_v45 = vpack.c.bf16 %v804_v44, %v804_v44  ;;  %v1535_v46 = vpop.f32.mrb[9].mxu0 }
 0x60c   : > { %v807_v47 = vpop.f32.mrb[10].mxu0 }
 0x60d   : > { %1034 = vrot.lane.b32.xlu0 %v810_v45, %s1922_s24  ;;  %v1536_v48 = vpop.f32.mrb[11].mxu0  ;;  %s2401_s24 = sld [smem:[#allocation22_spill]] }
 0x613   : > { %s2315_s13 = scalar_lea.hbm %s2401_s24, %s1472_s21 }
 0x62e   : > { %v915_v50 = vpop.f32.mrb[12].mxu0 }
 0x62f   : > { %v921_v51 = vpack.c.bf16 %v915_v50, %v915_v50  ;;  %v1547_v52 = vpop.f32.mrb[13].mxu0  ;;  %v1465_v50 = vld [vmem:[%s2370_s12] ss:$0 sm:$0xff] }
 0x630   : > { %v918_v54 = vpop.f32.mrb[14].mxu0 }
 0x631   : > { %1037 = vrot.lane.b32.xlu1 %v921_v51, %s1923_s19  ;;  %v1548_v55 = vpop.f32.mrb[15].mxu0  ;;  %s1835_s19 = scalar_lea.vmem %s1834_s17, 256 }
 0x636   : > { %v1026_v56 = vpop.f32.mrb[16].mxu0 }
 0x637   : > { %v1032_v57 = vpack.c.bf16 %v1026_v56, %v1026_v56  ;;  %v1559_v58 = vpop.f32.mrb[17].mxu0 }
 0x638   : > { %v1029_v59 = vpop.f32.mrb[18].mxu0 }
 0x639   : > { %1040 = vrot.lane.b32.xlu0 %v1032_v57, %s1924_s20  ;;  %v1560_v60 = vpop.f32.mrb[19].mxu0  ;;  %s480_s20 = sand.u32 1, %s1895_s26  }
 0x63a   : > { %s1439_s30 = sshll.u32 %s480_s20, 3  ;;  %s1314_s29 = scalar_lea.sflag [#allocation5], %s480_s20 }
 0x63b   : > { %s482_s15 = scalar_lea.vmem [#allocation11], %s1439_s30 }
 0x63c   : > { %s1327_s27 = sshll.u32 %s482_s15, 4  ;;  %s2317_s27 = int_to_ptr.vmem [resolvable:$true] %s1327_s27 }
 0x63d   : > { %s1829_s16 = scalar_lea.vmem %s2317_s27, 128  ;;  %p1836_p8 = scmp.lt.s32.totalorder %s2317_s27, %s1834_s17 }
 0x63e   : > { %p1830_p2 = scmp.ne.s32.totalorder %s2317_s27, %s1829_s16  ;;  %p1837_p11 = scmp.lt.s32.totalorder %s1835_s19, %s1829_s16 }
 0x640   : > { %p1831_p4 = pnand %p1830_p2, %p2402_p3  ;;  %p1838_p13 = por %p1837_p11, %p1836_p8 }
 0x642   : > { %p1832_p7 = pneg %p1831_p4 }
 0x644   : > { %p1839_p1 = pnand %p1838_p13, %p1832_p7 }
 0x67f   : > { %v1035_v61 = vpop.permute.xlu0 %1034 }
 0x680   : > { %v1044_v1 = vsel %vm591_vm2, %v699_v62, %v1035_v61 }
 0x6a3   : > { %v1038_v63 = vpop.permute.xlu1 %1037 }
 0x6a4   : > { %v1047_v2 = vsel %vm1045_vm4, %v1044_v1, %v1038_v63 }
 0x6ab   : > { %v1041_v3 = vpop.permute.xlu0 %1040 }
 0x6ac   : > { %v1050_v4 = vsel %vm1048_vm5, %v1047_v2, %v1041_v3 }
 0x6ad   : > { %1053 = vst.msk [vmem:[#allocation2] sm:$0xf] %vm1052_vm6, %v1050_v4 }
 0x6b4   : > { %v1054_v5 = vld [vmem:[#allocation2] sm:$0xf] }
 0x6b5   : > { %1566 = vmatmul.mubr.msk.bf16.vlgmr.msra.gmra.mrb[16].mxu1 %vm491_vm0, %v1054_v5 }
 0x6b6   : > { %1585 = vmatprep.mubr.msk.bf16.mxu1 %vm1910_vm1, %v1909_v8  ;;  %1578 = vmatpush3.bf16.msra.mxu1 %v1691_v31 }
 0x6b7   : > { %1579 = vmatprep.subr.bf16.mxu1 %v1909_v8 }
 0x6ba   : > { %1580 = vmatpush3.bf16.msra.mxu1 %v1692_v32 }
 0x6bb   : > { %1581 = vmatprep.subr.bf16.mxu1 %v1909_v8 }
 0x6be   : > { %1582 = vmatpush3.bf16.msra.mxu1 %v1693_v33 }
 0x6bf   : > { %1583 = vmatprep.subr.bf16.mxu1 %v1909_v8 }
 0x6c2   : > { %1584 = vmatpush3.bf16.msra.mxu1 %v1694_v34 }
 0x788   : > { %v1115_v7 = vpop.f32.mrb[16].mxu1 }
 0x789   : > { %v1116_v9 = vadd.f32 %v1455_v6, %v1115_v7  ;;  %v1567_v10 = vpop.f32.mrb[17].mxu1 }
 0x78a   : > { %v1118_v11 = vpop.f32.mrb[18].mxu1 }
 0x78b   : > { %v2274_v12 = vadd.f32 %v1116_v9, %v2170_v0  ;;  %v1568_v13 = vpop.f32.mrb[19].mxu1  ;;  %v1690_v0 = vld [vmem:[%s2367_s9 + $0x8] sm:$0xff]  }
 0x78c   : > { %1572 = vmatpush3.bf16.msra.mxu0 %v1690_v0 }
 0x78d   : > { %v1124_v14 = vsel %vm491_vm0, %v2274_v12, 0.0 }
 0x78e   : > { %1125 = vadd.xlane.f32.xlu1 %v1124_v14 }
 0x81b   : > { %v1126_v15 = vpop.xlane.xlu1 %1125 }
 0x81c   : > { %v1127_v16 = vmul.f32 0.03125, %v1126_v15 }
 0x81e   : > { %v1128_v17 = vsub.f32 %v2274_v12, %v1127_v16 }
 0x820   : > { %v1129_v18 = vmul.f32 %v1128_v17, %v1128_v17 }
 0x822   : > { %v1130_v19 = vsel %vm491_vm0, %v1129_v18, 0.0 }
 0x823   : > { %1131 = vadd.xlane.f32.xlu0 %v1130_v19 }
 0x8b0   : > { %v1132_v21 = vpop.xlane.xlu0 %1131 }
 0x8b1   : > { %v1133_v22 = vmul.f32 0.03125, %v1132_v21 }
 0x8b3   : > { %v1134_v23 = vadd.f32 1e-05, %v1133_v22 }
 0x8b5   : > { %1713 = vrsqrt.f32 %v1134_v23 }
 0x8bf   : > { %v1714_v24 = vpop.eup %1713 }
 0x8c0   : > { %v1136_v26 = vmul.f32 %v1714_v24, %v1128_v17 }
 0x8c2   : > { %v1143_v28 = vmul.f32 %v1459_v25, %v1136_v26 }
 0x8c4   : > { %v1150_v29 = vadd.f32 %v1460_v27, %v1143_v28 }
 0x8c6   : > { %v1151_v30 = vpack.c.bf16 %v1150_v29, %v1150_v29 }
 0x8c8   : > { %1574 = vmatmul.mubr.msk.bf16.vlgmr.msra.gmra.mrb[20].mxu0 %vm491_vm0, %v1151_v30 }
 0x99b   : > { %v1212_v36 = vpop.f32.mrb[20].mxu0 }
 0x99c   : > { %v1213_v37 = vadd.f32 %v1461_v35, %v1212_v36  ;;  %v1575_v38 = vpop.f32.mrb[21].mxu0 }
 0x99d   : > { %v1215_v39 = vpop.f32.mrb[22].mxu0 }
 0x99e   : > { %v1218_v40 = vmul.f32 %v1213_v37, %v1213_v37  ;;  %v1576_v41 = vpop.f32.mrb[23].mxu0 }
 0x9a0   : > { %v1219_v42 = vmul.f32 %v1218_v40, %v1213_v37 }
 0x9a2   : > { %v1220_v43 = vmul.f32 0.044715, %v1219_v42 }
 0x9a4   : > { %v1221_v8 = vadd.f32 %v1220_v43, %v1213_v37 }
 0x9a6   : > { %v1222_v44 = vmul.f32 0.7978846, %v1221_v8 }
 0x9a8   : > { %1715 = vtanh.f32 %v1222_v44 }
 0x9b2   : > { %v1716_v45 = vpop.eup %1715 }
 0x9b3   : > { %v1224_v46 = vadd.f32 1.0, %v1716_v45 }
 0x9b5   : > { %v1225_v47 = vmul.f32 0.5, %v1224_v46 }
 0x9b7   : > { %v1226_v48 = vmul.f32 %v1225_v47, %v1213_v37 }
 0x9b9   : > { %v1227_v49 = vpack.c.bf16 %v1226_v48, %v1226_v48 }
 0x9bb   : > { %1586 = vmatmul.mubr.msk.bf16.vlgmr.msra.gmra.mrb[20].mxu1 %vm1267_vm7, %v1227_v49 }
 0xa8e   : > { %v1305_v51 = vpop.f32.mrb[20].mxu1 }
 0xa8f   : > { %v1306_v52 = vadd.f32 %v1465_v50, %v1305_v51  ;;  %v1587_v53 = vpop.f32.mrb[21].mxu1 }
 0xa90   : > { %v1308_v54 = vpop.f32.mrb[22].mxu1 }
 0xa91   : > { %v1311_v55 = vadd.f32 %v1306_v52, %v2274_v12  ;;  %v1588_v56 = vpop.f32.mrb[23].mxu1 }
 0xa93   : > { %1312 = vst.msk [vmem:[%s482_s15] sm:$0xff] %vm491_vm0, %v1311_v55 }
 0xa94   : > { %1842 = shalt.err (!%p1839_p1)
}
 0xa95   : > { %s1843_s20 = scalar_lea.hbm %s2315_s13, 128  ;;  %s1847_s25 = scalar_lea.hbm %s2401_s24, 256 }
 0xa96   : > { %p1844_p0 = scmp.ne.s32.totalorder %s2315_s13, %s1843_s20  ;;  %p1848_p9 = scmp.lt.u32.totalorder %s2315_s13, %s2401_s24 }
 0xa97   : > { %p1849_p12 = scmp.lt.u32.totalorder %s1847_s25, %s1843_s20  ;;  %p1851_p2 = scmp.lt.u32.totalorder %s1843_s20, %s2315_s13 }
 0xa98   : > { %p1845_p6 = pnand %p1844_p0, %p2402_p3 }
 0xa99   : > { %p1850_p10 = por %p1849_p12, %p1848_p9 }
 0xa9a   : > { %p1846_p5 = pneg %p1845_p6 }
 0xa9b   : > { %p1852_p4 = por %p1851_p2, %p1850_p10 }
 0xa9d   : > { %p1853_p7 = pnand %p1852_p4, %p1846_p5 }
 0xa9f   : > { %1856 = shalt.err (!%p1853_p7)
}
 0xaa0   : > { %1605 = dma.vmem_to_hbm [thread:$0]  (%p2402_p3), %s2317_s27, 128, %s2315_s13, %s1314_s29  }
 0xaa1 PF: > { %s2403_s14 = sld [smem:[#allocation18_spill]]  ;;  %s2404_s22 = sld [smem:[#allocation16_spill]] }
 0xaa2   : > { %s2405_s16 = sld [smem:[#allocation21_spill]] }
 0xaa7   : > { %p1632_p8 = scmp.ge.s32.totalorder %s2403_s14, 2  ;;  %s1339_s28 = sand.u32 1, %s2404_s22  }
 0xaa8   : > { %p2406_p11 = scmp.ne.s32.totalorder %s2405_s16, 0  ;;  %s1340_s17 = scalar_lea.sflag [#allocation5], %s1339_s28 }
 0xaaa   : > { %p1621_p13 = pnand %p1632_p8, %p2406_p11 }
 0xaac   : > { %1886 = dma.done.wait (!%p1621_p13), %s1340_s17, 128  }
 0xaad   : > { %1888 = vsyncadd (!%p1621_p13), %s1340_s17, 4294967168  ;;  %s2407_s28 = sld [smem:[#allocation19_spill]]  ;;  %s2408_s19 = sld [smem:[#allocation17_spill]] }
 0xaae   : > { %s2409_s27 = sld [smem:[#allocation20_spill]]  ;;  %s2410_s25 = smov %s1895_s26 }
 0xab3   : > { %p26_p1 = scmp.ge.s32.totalorder %s2407_s28, 4   ;;  %s2411_s26 = smov %s2408_s19 }
 0xab5   :  { %28 = sbr.rel (!%p26_p1) target bundleno = 8 (0x8), region = 124 }
 0xabc   :  { %1345 = vsyncpa [#allocation4], 1 }
 0xabd   :  { %1347 = vsyncpa [#allocation4 + $0x1], 1 }
 0xabe   :  { %1348 = vsyncpa [#allocation7], 1 }
 0xabf   :  { %1349 = vsyncpa [#allocation10], 1 }
 0xac0   :  { %1350 = vsyncpa [#allocation5], 1 }
 0xac1   :  { %1352 = vsyncpa [#allocation5 + $0x1], 1 }

</bundles_post_ra>
